<compile_context>
chip_gen: v7x
topology: tpu7x:2x2x1
jax: 0.10.0
libtpu: 0.0.40
codegen_flags: <defaults>
</compile_context>

<pallas_src>
import functools

import jax
import jax.numpy as jnp
from jax.experimental import pallas as pl
from jax.experimental.pallas import tpu as pltpu

# Logical (PyTorch) dims.
D_IN, D_H1, D_H2, D_OUT = 30, 120, 84, 2
# Lane-padded dims used inside the kernel.
P_IN, P_H1, P_H2, P_OUT = 32, 128, 128, 128


def mlp_kernel(x_ref, w1_ref, b1_ref, w2_ref, b2_ref, w3_ref, b3_ref, o_ref):
    # x / w* may be bf16 (v6e/v7x fast path); biases and accumulators stay f32.
    x = x_ref[...]
    h1 = jnp.dot(x, w1_ref[...], preferred_element_type=jnp.float32) + b1_ref[...]
    h1 = jnp.maximum(h1, 0.0).astype(w2_ref.dtype)
    h2 = jnp.dot(h1, w2_ref[...], preferred_element_type=jnp.float32) + b2_ref[...]
    h2 = jnp.maximum(h2, 0.0).astype(w3_ref.dtype)
    o_ref[...] = (
        jnp.dot(h2, w3_ref[...], preferred_element_type=jnp.float32) + b3_ref[...]
    ).astype(o_ref.dtype)


def _pad2(a, rows, cols):
    return jnp.pad(a, ((0, rows - a.shape[0]), (0, cols - a.shape[1])))


@functools.partial(jax.jit, static_argnames=("bm", "compute_dtype"))
def net_forward(x, params, *, bm=256, compute_dtype=jnp.float32):
    """x: (B, 30) float32. Returns (B, 2) float32."""
    w1, b1, w2, b2, w3, b3 = params
    B = x.shape[0]

    # Adaptive batch tile: multiple of 8 sublanes, no larger than needed, capped
    # at bm so large batches pipeline over multiple grid steps.
    bm_eff = min(bm, 8 * pl.cdiv(B, 8))
    b_pad = bm_eff * pl.cdiv(B, bm_eff)

    # Zero-pad everything to lane-friendly shapes (padding is mathematically inert).
    xp = jnp.pad(x, ((0, b_pad - B), (0, P_IN - D_IN))).astype(compute_dtype)
    w1p = _pad2(w1, P_IN, P_H1).astype(compute_dtype)
    w2p = _pad2(w2, P_H1, P_H2).astype(compute_dtype)
    w3p = _pad2(w3, P_H2, P_OUT).astype(compute_dtype)
    b1p = _pad2(b1, 1, P_H1)  # biases stay f32 (added to the f32 accumulators)
    b2p = _pad2(b2, 1, P_H2)
    b3p = _pad2(b3, 1, P_OUT)

    grid = (b_pad // bm_eff,)
    full = lambda shape: pl.BlockSpec(shape, lambda i: (0, 0))  # VMEM-resident weights
    out = pl.pallas_call(
        mlp_kernel,
        out_shape=jax.ShapeDtypeStruct((b_pad, P_OUT), jnp.float32),
        grid_spec=pltpu.PrefetchScalarGridSpec(
            num_scalar_prefetch=0,
            grid=grid,
            in_specs=[
                pl.BlockSpec((bm_eff, P_IN), lambda i: (i, 0)),  # x tile: only per-step DMA
                full((P_IN, P_H1)),   # w1
                full((1, P_H1)),      # b1
                full((P_H1, P_H2)),   # w2
                full((1, P_H2)),      # b2
                full((P_H2, P_OUT)),  # w3 (output zero-padded out to 128 lanes)
                full((1, P_OUT)),     # b3
            ],
            out_specs=pl.BlockSpec((bm_eff, P_OUT), lambda i: (i, 0)),  # lane-dense store
        ),
        compiler_params=pltpu.CompilerParams(
            dimension_semantics=("parallel",),  # v7x: shards batch tiles across both TCs
        ),
    )(xp, w1p, b1p, w2p, b2p, w3p, b3p)
    return out[:B, :D_OUT]


def init_params(key):
    """Deterministic init mimicking nn.Linear's U(-1/sqrt(fan_in), 1/sqrt(fan_in))."""
    keys = jax.random.split(key, 6)

    def linear(kw, kb, fan_in, fan_out):
        bound = 1.0 / jnp.sqrt(jnp.float32(fan_in))
        w = jax.random.uniform(kw, (fan_in, fan_out), jnp.float32, -bound, bound)
        b = jax.random.uniform(kb, (1, fan_out), jnp.float32, -bound, bound)
        return w, b

    w1, b1 = linear(keys[0], keys[1], D_IN, D_H1)
    w2, b2 = linear(keys[2], keys[3], D_H1, D_H2)
    w3, b3 = linear(keys[4], keys[5], D_H2, D_OUT)
    return (w1, b1, w2, b2, w3, b3)


def net_forward_ref(x, params):
    w1, b1, w2, b2, w3, b3 = params
    h1 = jnp.maximum(x @ w1 + b1, 0.0)
    h2 = jnp.maximum(h1 @ w2 + b2, 0.0)
    return h2 @ w3 + b3


if __name__ == "__main__":
    key = jax.random.PRNGKey(0)
    k_param, k_x = jax.random.split(key)
    params = init_params(k_param)

    B = 16  # small demo batch; wrapper pads it up to one 16-row tile
    x = jax.random.normal(k_x, (B, D_IN), jnp.float32)

    # Default f32 path — matches the reference tightly.
    out = jax.block_until_ready(net_forward(x, params))
    ref = net_forward_ref(x, params)
    assert out.shape == (B, D_OUT)
    assert jnp.allclose(out, ref, atol=1e-5, rtol=1e-5)

    # bf16-feed path (recommended on v6e/v7x): halved DMA bytes, f32 accumulation.
    out_bf16 = jax.block_until_ready(
        net_forward(x, params, compute_dtype=jnp.bfloat16)
    )
    assert out_bf16.shape == (B, D_OUT)
    assert jnp.allclose(out_bf16, ref, atol=2e-1, rtol=2e-1)

    # Multi-tile batch exercise (grid > 1, batch axis pipelined/parallel).
    B2 = 600
    x2 = jax.random.normal(jax.random.PRNGKey(1), (B2, D_IN), jnp.float32)
    out2 = jax.block_until_ready(net_forward(x2, params))
    ref2 = net_forward_ref(x2, params)
    assert out2.shape == (B2, D_OUT)
    assert jnp.allclose(out2, ref2, atol=1e-5, rtol=1e-5)

    print("KERNEL_OK")
</pallas_src>

<mosaic_0001>
module attributes {stable_mosaic.version = 11 : i64} {
  func.func @mlp_kernel(%arg0: i32, %arg1: memref<16x32xf32, #tpu.memory_space<vmem>>, %arg2: memref<32x128xf32, #tpu.memory_space<vmem>>, %arg3: memref<1x128xf32, #tpu.memory_space<vmem>>, %arg4: memref<128x128xf32, #tpu.memory_space<vmem>>, %arg5: memref<1x128xf32, #tpu.memory_space<vmem>>, %arg6: memref<128x128xf32, #tpu.memory_space<vmem>>, %arg7: memref<1x128xf32, #tpu.memory_space<vmem>>, %arg8: memref<16x128xf32, #tpu.memory_space<vmem>>) attributes {dimension_semantics = [#tpu.dimension_semantics<parallel>], iteration_bounds = array<i64: 1>, scalar_prefetch = 0 : i64, scratch_operands = 0 : i64, tpu.core_type = #tpu.core_type<tc>, window_params = [{transform_indices = @transform_0, window_bounds = array<i64: 16, 32>}, {pipeline_mode = #tpu.pipeline_mode<synchronous>, transform_indices = @transform_1, window_bounds = array<i64: 32, 128>}, {pipeline_mode = #tpu.pipeline_mode<synchronous>, transform_indices = @transform_2, window_bounds = array<i64: 1, 128>}, {pipeline_mode = #tpu.pipeline_mode<synchronous>, transform_indices = @transform_3, window_bounds = array<i64: 128, 128>}, {pipeline_mode = #tpu.pipeline_mode<synchronous>, transform_indices = @transform_4, window_bounds = array<i64: 1, 128>}, {pipeline_mode = #tpu.pipeline_mode<synchronous>, transform_indices = @transform_5, window_bounds = array<i64: 128, 128>}, {pipeline_mode = #tpu.pipeline_mode<synchronous>, transform_indices = @transform_6, window_bounds = array<i64: 1, 128>}, {transform_indices = @transform_7, window_bounds = array<i64: 16, 128>}]} {
    %c0 = arith.constant 0 : index
    %c0_0 = arith.constant 0 : index
    %0 = vector.load %arg1[%c0, %c0_0] : memref<16x32xf32, #tpu.memory_space<vmem>>, vector<16x32xf32>
    %c0_1 = arith.constant 0 : index
    %c0_2 = arith.constant 0 : index
    %1 = vector.load %arg2[%c0_1, %c0_2] : memref<32x128xf32, #tpu.memory_space<vmem>>, vector<32x128xf32>
    %cst = arith.constant dense<0.000000e+00> : vector<16x128xf32>
    %2 = tpu.matmul %0, %1, %cst {dimension_numbers = #tpu.dot_dimension_numbers<[1], [0], [0], [1], [0, 0, 1, 1], [], []>} : vector<16x32xf32>, vector<32x128xf32>, vector<16x128xf32> -> vector<16x128xf32>
    %c0_3 = arith.constant 0 : index
    %c0_4 = arith.constant 0 : index
    %3 = vector.load %arg3[%c0_3, %c0_4] : memref<1x128xf32, #tpu.memory_space<vmem>>, vector<1x128xf32>
    %4 = vector.broadcast %3 : vector<1x128xf32> to vector<16x128xf32>
    %5 = arith.addf %2, %4 : vector<16x128xf32>
    %cst_5 = arith.constant 0.000000e+00 : f32
    %6 = vector.broadcast %cst_5 : f32 to vector<16x128xf32>
    %7 = arith.maximumf %5, %6 : vector<16x128xf32>
    %c0_6 = arith.constant 0 : index
    %c0_7 = arith.constant 0 : index
    %8 = vector.load %arg4[%c0_6, %c0_7] : memref<128x128xf32, #tpu.memory_space<vmem>>, vector<128x128xf32>
    %cst_8 = arith.constant dense<0.000000e+00> : vector<16x128xf32>
    %9 = tpu.matmul %7, %8, %cst_8 {dimension_numbers = #tpu.dot_dimension_numbers<[1], [0], [0], [1], [0, 0, 1, 1], [], []>} : vector<16x128xf32>, vector<128x128xf32>, vector<16x128xf32> -> vector<16x128xf32>
    %c0_9 = arith.constant 0 : index
    %c0_10 = arith.constant 0 : index
    %10 = vector.load %arg5[%c0_9, %c0_10] : memref<1x128xf32, #tpu.memory_space<vmem>>, vector<1x128xf32>
    %11 = vector.broadcast %10 : vector<1x128xf32> to vector<16x128xf32>
    %12 = arith.addf %9, %11 : vector<16x128xf32>
    %cst_11 = arith.constant 0.000000e+00 : f32
    %13 = vector.broadcast %cst_11 : f32 to vector<16x128xf32>
    %14 = arith.maximumf %12, %13 : vector<16x128xf32>
    %c0_12 = arith.constant 0 : index
    %c0_13 = arith.constant 0 : index
    %15 = vector.load %arg6[%c0_12, %c0_13] : memref<128x128xf32, #tpu.memory_space<vmem>>, vector<128x128xf32>
    %cst_14 = arith.constant dense<0.000000e+00> : vector<16x128xf32>
    %16 = tpu.matmul %14, %15, %cst_14 {dimension_numbers = #tpu.dot_dimension_numbers<[1], [0], [0], [1], [0, 0, 1, 1], [], []>} : vector<16x128xf32>, vector<128x128xf32>, vector<16x128xf32> -> vector<16x128xf32>
    %c0_15 = arith.constant 0 : index
    %c0_16 = arith.constant 0 : index
    %17 = vector.load %arg7[%c0_15, %c0_16] : memref<1x128xf32, #tpu.memory_space<vmem>>, vector<1x128xf32>
    %18 = vector.broadcast %17 : vector<1x128xf32> to vector<16x128xf32>
    %19 = arith.addf %16, %18 : vector<16x128xf32>
    %c0_17 = arith.constant 0 : index
    %c0_18 = arith.constant 0 : index
    %20 = vector.load %arg8[%c0_17, %c0_18] : memref<16x128xf32, #tpu.memory_space<vmem>>, vector<16x128xf32>
    tpu.vector_store %arg8[%c0_17, %c0_18], %19 {strides = array<i32>} : memref<16x128xf32, #tpu.memory_space<vmem>>, vector<16x128xf32>,
    return
  }
  func.func @transform_0(%arg0: i32) -> (i32, i32) {
    %c0_i32 = arith.constant 0 : i32
    %c0_i32_0 = arith.constant 0 : i32
    return %arg0, %c0_i32 : i32, i32
  }
  func.func @transform_1(%arg0: i32) -> (i32, i32) {
    %c0_i32 = arith.constant 0 : i32
    %c0_i32_0 = arith.constant 0 : i32
    %c0_i32_1 = arith.constant 0 : i32
    return %c0_i32, %c0_i32_0 : i32, i32
  }
  func.func @transform_2(%arg0: i32) -> (i32, i32) {
    %c0_i32 = arith.constant 0 : i32
    %c0_i32_0 = arith.constant 0 : i32
    %c0_i32_1 = arith.constant 0 : i32
    return %c0_i32, %c0_i32_0 : i32, i32
  }
  func.func @transform_3(%arg0: i32) -> (i32, i32) {
    %c0_i32 = arith.constant 0 : i32
    %c0_i32_0 = arith.constant 0 : i32
    %c0_i32_1 = arith.constant 0 : i32
    return %c0_i32, %c0_i32_0 : i32, i32
  }
  func.func @transform_4(%arg0: i32) -> (i32, i32) {
    %c0_i32 = arith.constant 0 : i32
    %c0_i32_0 = arith.constant 0 : i32
    %c0_i32_1 = arith.constant 0 : i32
    return %c0_i32, %c0_i32_0 : i32, i32
  }
  func.func @transform_5(%arg0: i32) -> (i32, i32) {
    %c0_i32 = arith.constant 0 : i32
    %c0_i32_0 = arith.constant 0 : i32
    %c0_i32_1 = arith.constant 0 : i32
    return %c0_i32, %c0_i32_0 : i32, i32
  }
  func.func @transform_6(%arg0: i32) -> (i32, i32) {
    %c0_i32 = arith.constant 0 : i32
    %c0_i32_0 = arith.constant 0 : i32
    %c0_i32_1 = arith.constant 0 : i32
    return %c0_i32, %c0_i32_0 : i32, i32
  }
  func.func @transform_7(%arg0: i32) -> (i32, i32) {
    %c0_i32 = arith.constant 0 : i32
    %c0_i32_0 = arith.constant 0 : i32
    return %arg0, %c0_i32 : i32, i32
  }
}

</mosaic_0001>

<bundles_post_ra>
// kernel: net_forward.1
= control target key start
LH: loop header
LB: loop body
LE: loop exit
PB: predicated region body
PF: predicated region fallthrough
CT: control target
= control target key end

     0   :  { %vm39_vm0 = vcmask 261120   ;;  %s698_s1 = inlined_call_operand.vmem [shape: f32[32,128], index: 1, kind: input, shape index: {}]   ;;  %s699_s0 = inlined_call_operand.vmem [shape: f32[16,32], index: 0, kind: input, shape index: {}]   ;;  %s700_s3 = inlined_call_operand.vmem [shape: f32[128,128], index: 3, kind: input, shape index: {}]   ;;  %s701_s5 = inlined_call_operand.vmem [shape: f32[128,128], index: 5, kind: input, shape index: {}]   ;;  %s702_s2 = inlined_call_operand.vmem [shape: f32[1,128], index: 2, kind: input, shape index: {}]   ;;  %s703_s4 = inlined_call_operand.vmem [shape: f32[1,128], index: 4, kind: input, shape index: {}]   ;;  %s704_s6 = inlined_call_operand.vmem [shape: f32[1,128], index: 6, kind: input, shape index: {}]   ;;  %s705_s7 = inlined_call_operand.vmem [shape: f32[16,128], index: 7, kind: output, shape index: {}]  }
   0x1   :  { %v28_v0 = vld [vmem:[%s698_s1] sm:$0xff]  ;;  %v29_v1 = vld [vmem:[%s698_s1 + $0x8] sm:$0xff]  ;;  %v30_v2 = vld [vmem:[%s698_s1 + $0x10] sm:$0xff] }
   0x2   :  { %v455_v3 = vpack.c.bf16 %v29_v1, %v28_v0  ;;  %v31_v4 = vld [vmem:[%s698_s1 + $0x18] sm:$0xff]  ;;  %v26_v5 = vld [vmem:[%s699_s0] sm:$0xff]  ;;  %v124_v8 = vld [vmem:[%s700_s3 + $0x8] sm:$0xff] }
   0x3   :  { %v459_v6 = vpack.c.bf16 %v31_v4, %v30_v2  ;;  %382 = vmatprep.mubr.msk.f32.mxu0 %vm39_vm0, %v26_v5  ;;  %v123_v7 = vld [vmem:[%s700_s3] sm:$0xff]  ;;  %v125_v9 = vld [vmem:[%s700_s3 + $0x10] sm:$0xff]  ;;  %v126_v11 = vld [vmem:[%s700_s3 + $0x18] sm:$0xff] }
   0x4   :  { %456 = vmatprep.subr.bf16.mxu0 %v455_v3  ;;  %v463_v10 = vpack.c.bf16 %v124_v8, %v123_v7  ;;  %v467_v12 = vpack.c.bf16 %v126_v11, %v125_v9  ;;  %v127_v13 = vld [vmem:[%s700_s3 + $0x20] sm:$0xff]  ;;  %v128_v14 = vld [vmem:[%s700_s3 + $0x28] sm:$0xff]  ;;  %v129_v17 = vld [vmem:[%s700_s3 + $0x30] sm:$0xff] }
   0x5   :  { %458 = vmatpush3.bf16.msra.mxu0 %v455_v3  ;;  %v471_v15 = vpack.c.bf16 %v128_v14, %v127_v13  ;;  %v27_v16 = vld [vmem:[%s699_s0 + $0x8] sm:$0xff]  ;;  %v130_v18 = vld [vmem:[%s700_s3 + $0x38] sm:$0xff]  ;;  %v131_v20 = vld [vmem:[%s700_s3 + $0x40] sm:$0xff] }
   0x6   :  { %460 = vmatprep.subr.bf16.mxu0 %v459_v6  ;;  %464 = vmatprep.subr.bf16.mxu1 %v463_v10  ;;  %v475_v19 = vpack.c.bf16 %v130_v18, %v129_v17  ;;  %v132_v21 = vld [vmem:[%s700_s3 + $0x48] sm:$0xff]  ;;  %v133_v23 = vld [vmem:[%s700_s3 + $0x50] sm:$0xff]  ;;  %v134_v24 = vld [vmem:[%s700_s3 + $0x58] sm:$0xff] }
   0x7   :  { %466 = vmatpush3.bf16.msra.mxu1 %v463_v10  ;;  %v479_v22 = vpack.c.bf16 %v132_v21, %v131_v20  ;;  %v483_v25 = vpack.c.bf16 %v134_v24, %v133_v23  ;;  %v135_v26 = vld [vmem:[%s700_s3 + $0x60] sm:$0xff]  ;;  %v136_v27 = vld [vmem:[%s700_s3 + $0x68] sm:$0xff]  ;;  %v137_v29 = vld [vmem:[%s700_s3 + $0x70] sm:$0xff] }
   0x8   :  { %468 = vmatprep.subr.bf16.mxu1 %v467_v12  ;;  %v487_v28 = vpack.c.bf16 %v136_v27, %v135_v26  ;;  %v138_v30 = vld [vmem:[%s700_s3 + $0x78] sm:$0xff]  ;;  %v223_v32 = vld [vmem:[%s701_s5] sm:$0xff]  ;;  %v224_v33 = vld [vmem:[%s701_s5 + $0x8] sm:$0xff] }
   0x9   :  { %462 = vmatpush3.bf16.msra.mxu0 %v459_v6  ;;  %v491_v31 = vpack.c.bf16 %v138_v30, %v137_v29  ;;  %v225_v34 = vld [vmem:[%s701_s5 + $0x10] sm:$0xff]  ;;  %v495_v35 = vpack.c.bf16 %v224_v33, %v223_v32  ;;  %v226_v36 = vld [vmem:[%s701_s5 + $0x18] sm:$0xff]  ;;  %v227_v38 = vld [vmem:[%s701_s5 + $0x20] sm:$0xff] }
   0xa   :  { %v499_v37 = vpack.c.bf16 %v226_v36, %v225_v34  ;;  %v228_v39 = vld [vmem:[%s701_s5 + $0x28] sm:$0xff]  ;;  %v229_v41 = vld [vmem:[%s701_s5 + $0x30] sm:$0xff]  ;;  %v230_v42 = vld [vmem:[%s701_s5 + $0x38] sm:$0xff] }
   0xb   :  { %470 = vmatpush3.bf16.msra.mxu1 %v467_v12  ;;  %496 = vmatprep.subr.bf16.mxu0 %v495_v35  ;;  %v503_v40 = vpack.c.bf16 %v228_v39, %v227_v38  ;;  %v507_v43 = vpack.c.bf16 %v230_v42, %v229_v41  ;;  %v231_v44 = vld [vmem:[%s701_s5 + $0x40] sm:$0xff]  ;;  %v232_v45 = vld [vmem:[%s701_s5 + $0x48] sm:$0xff]  ;;  %v233_v47 = vld [vmem:[%s701_s5 + $0x50] sm:$0xff] }
   0xc   :  { %383 = vmatmul.mubr.msk.f32.vlgmr.msra.gmra.mrb[0].mxu0 %vm39_vm0, %v27_v16  ;;  %472 = vmatprep.subr.bf16.mxu1 %v471_v15  ;;  %v511_v46 = vpack.c.bf16 %v232_v45, %v231_v44  ;;  %v234_v48 = vld [vmem:[%s701_s5 + $0x58] sm:$0xff]  ;;  %v235_v50 = vld [vmem:[%s701_s5 + $0x60] sm:$0xff]  ;;  %v236_v51 = vld [vmem:[%s701_s5 + $0x68] sm:$0xff] }
   0xd   :  { %498 = vmatpush3.bf16.msra.mxu0 %v495_v35  ;;  %v515_v49 = vpack.c.bf16 %v234_v48, %v233_v47  ;;  %v519_v52 = vpack.c.bf16 %v236_v51, %v235_v50  ;;  %v327_v53 = vld [vmem:[%s702_s2] ss:$0 sm:$0xff]  ;;  %v237_v60 = vld [vmem:[%s701_s5 + $0x70] sm:$0xff]  ;;  %v238_v61 = vld [vmem:[%s701_s5 + $0x78] sm:$0xff] }
   0xe   :  { %500 = vmatprep.subr.bf16.mxu0 %v499_v37  ;;  %v523_v62 = vpack.c.bf16 %v238_v61, %v237_v60  ;;  %v330_v63 = vld [vmem:[%s703_s4] ss:$0 sm:$0xff] }
   0xf   :  { %474 = vmatpush3.bf16.msra.mxu1 %v471_v15  ;;  %v331_v6 = vld [vmem:[%s704_s6] ss:$0 sm:$0xff] }
  0x10   :  { %476 = vmatprep.subr.bf16.mxu1 %v475_v19 }
  0x11   :  { %502 = vmatpush3.bf16.msra.mxu0 %v499_v37 }
  0x12   :  { %504 = vmatprep.subr.bf16.mxu0 %v503_v40 }
  0x13   :  { %478 = vmatpush3.bf16.msra.mxu1 %v475_v19 }
  0x14   :  { %480 = vmatprep.subr.bf16.mxu1 %v479_v22 }
  0x15   :  { %506 = vmatpush3.bf16.msra.mxu0 %v503_v40 }
  0x16   :  { %508 = vmatprep.subr.bf16.mxu0 %v507_v43 }
  0x17   :  { %482 = vmatpush3.bf16.msra.mxu1 %v479_v22 }
  0x18   :  { %484 = vmatprep.subr.bf16.mxu1 %v483_v25 }
  0x19   :  { %510 = vmatpush3.bf16.msra.mxu0 %v507_v43 }
  0x1a   :  { %512 = vmatprep.subr.bf16.mxu0 %v511_v46 }
  0x1b   :  { %486 = vmatpush3.bf16.msra.mxu1 %v483_v25 }
  0x1c   :  { %488 = vmatprep.subr.bf16.mxu1 %v487_v28 }
  0x1d   :  { %514 = vmatpush3.bf16.msra.mxu0 %v511_v46 }
  0x1e   :  { %516 = vmatprep.subr.bf16.mxu0 %v515_v49 }
  0x1f   :  { %490 = vmatpush3.bf16.msra.mxu1 %v487_v28 }
  0x20   :  { %492 = vmatprep.subr.bf16.mxu1 %v491_v31 }
  0x21   :  { %518 = vmatpush3.bf16.msra.mxu0 %v515_v49 }
  0x22   :  { %520 = vmatprep.subr.bf16.mxu0 %v519_v52 }
  0x23   :  { %494 = vmatpush3.bf16.msra.mxu1 %v491_v31 }
  0x25   :  { %522 = vmatpush3.bf16.msra.mxu0 %v519_v52 }
  0x26   :  { %524 = vmatprep.subr.bf16.mxu0 %v523_v62 }
  0x29   :  { %526 = vmatpush3.bf16.msra.mxu0 %v523_v62 }
  0xdf   :  { %v384_v54 = vpop.f32.mrb[0].mxu0 }
  0xe0   :  { %v118_v55 = vadd.f32 %v384_v54, %v327_v53  ;;  %v112_v56 = vpop.f32.mrb[1].mxu0 }
  0xe1   :  { %v113_v57 = vadd.f32 %v327_v53, %v112_v56 }
  0xe2   :  { %v122_v59 = vmax.f32 %v118_v55, 0.0 }
  0xe3   :  { %v121_v58 = vmax.f32 %v113_v57, 0.0 }
  0xe5   :  { %417 = vmatprep.mubr.f32.mxu1 %v121_v58 }
  0xe6   :  { %418 = vmatmul.mubr.f32.vlgmr.msra.gmra.mrb[0].mxu1 %v122_v59 }
 0x1b9   :  { %v419_v0 = vpop.f32.mrb[0].mxu1 }
 0x1ba   :  { %v218_v1 = vadd.f32 %v419_v0, %v330_v63  ;;  %v212_v2 = vpop.f32.mrb[1].mxu1 }
 0x1bb   :  { %v213_v3 = vadd.f32 %v330_v63, %v212_v2 }
 0x1bc   :  { %v222_v5 = vmax.f32 %v218_v1, 0.0 }
 0x1bd   :  { %v221_v4 = vmax.f32 %v213_v3, 0.0 }
 0x1bf   :  { %452 = vmatprep.mubr.f32.mxu0 %v221_v4 }
 0x1c0   :  { %453 = vmatmul.mubr.f32.vlgmr.msra.gmra.mrb[2].mxu0 %v222_v5 }
 0x293   :  { %v454_v7 = vpop.f32.mrb[2].mxu0 }
 0x294   :  { %v318_v8 = vadd.f32 %v454_v7, %v331_v6  ;;  %v312_v9 = vpop.f32.mrb[3].mxu0 }
 0x295   :  { %v313_v10 = vadd.f32 %v331_v6, %v312_v9 }
 0x296   :  { %322 = vst [vmem:[%s705_s7 + $0x8] sm:$0xff] %v318_v8 }
 0x297   :  { %321 = vst [vmem:[%s705_s7] sm:$0xff] %v313_v10 }

</bundles_post_ra>
